<compile_context>
chip_gen: v6e
topology: v6e:2x2x1
jax: 0.10.0
libtpu: 0.0.40
codegen_flags: <defaults>
</compile_context>

<pallas_src>
import jax
import jax.numpy as jnp
from jax.experimental import pallas as pl
from jax.experimental.pallas import tpu as pltpu


def _round_up(x, m):
    return ((x + m - 1) // m) * m


def _softmax_rows(z):
    """Row softmax in f32 using the EUP approximate reciprocal."""
    m = jnp.max(z, axis=-1, keepdims=True)
    e = jnp.exp(z - m)
    return e * pl.reciprocal(jnp.sum(e, axis=-1, keepdims=True), approx=True)


def _make_lp_kernel(in_dim, n_out, row_off):
    GT_W = 256  # packed gen|target output width (lane-tile aligned halves)
    f32 = jnp.float32
    bf16 = jnp.bfloat16

    def kernel(x_ref, wi_ref, w_ref, b_ref, out_ref):
        x = x_ref[...]      # (TB, in_dim)     bf16
        wi = wi_ref[...]    # (TB, in_dim + 1) bf16

        # fused generality|target "convs" (kernel_size=1, L=1) == dense + ReLU
        w_gt = w_ref[row_off["gt"]:row_off["gt"] + in_dim, 0:GT_W]
        gt = jnp.maximum(
            jnp.dot(x, w_gt, preferred_element_type=f32) + b_ref[0:1, 0:GT_W], 0.0)
        gen = gt[:, 0:100]        # generality features (lanes 0..99)
        tgt = gt[:, 128:228]      # target features (lane-tile aligned slice)

        # weight branch: conv + ReLU, then the 2-way softmax expressed as a
        # sigmoid of the logit difference (numerically identical for 2 classes).
        w_w = w_ref[row_off["w"]:row_off["w"] + in_dim + 1, 0:100]
        wfeat = jnp.maximum(
            jnp.dot(wi, w_w, preferred_element_type=f32) + b_ref[1:2, 0:100], 0.0)
        w_sd = w_ref[row_off["wsd"]:row_off["wsd"] + 100, 0:1]
        zd = (jnp.dot(wfeat.astype(bf16), w_sd, preferred_element_type=f32)
              + b_ref[2:3, 0:1])                                   # (TB, 1)
        w0 = pl.reciprocal(1.0 + jnp.exp(-zd), approx=True)        # softmax[..., 0]
        feature = gen * w0 + tgt * (1.0 - w0)

        # link classifier
        w_lc = w_ref[row_off["lc"]:row_off["lc"] + 100, 0:2]
        link = _softmax_rows(
            jnp.dot(feature.astype(bf16), w_lc, preferred_element_type=f32)
            + b_ref[3:4, 0:2])

        # grad_reverse is the identity in the forward pass (only flips grads)
        rev = gen

        # network classifier
        w_n1 = w_ref[row_off["n1"]:row_off["n1"] + 100, 0:60]
        h = jnp.maximum(
            jnp.dot(rev.astype(bf16), w_n1, preferred_element_type=f32)
            + b_ref[4:5, 0:60], 0.0)
        w_n2 = w_ref[row_off["n2"]:row_off["n2"] + 60, 0:n_out]
        net = _softmax_rows(
            jnp.dot(h.astype(bf16), w_n2, preferred_element_type=f32)
            + b_ref[5:6, 0:n_out])

        # combined output slab: [link | net]
        out_ref[:, 0:2] = link.astype(out_ref.dtype)
        out_ref[:, 2:2 + n_out] = net.astype(out_ref.dtype)

    return kernel


def _pack_params(params, in_dim, n_out, weight_dtype=jnp.bfloat16):
    """Pack all weights into one bf16 slab and all biases into one f32 slab."""
    GT_W = 256
    slab_w = max(256, _round_up(max(100, 60, n_out, 2), 128))

    segs = [("gt", in_dim), ("w", in_dim + 1), ("wsd", 100),
            ("lc", 100), ("n1", 100), ("n2", 60)]
    row_off, r = {}, 0
    for name, rows in segs:
        row_off[name] = r
        r += _round_up(rows, 16)          # bf16 sublane-pack friendly offsets
    total_rows = _round_up(r, 16)

    # gen | target weights at lane-tile-aligned column offsets 0 / 128
    w_gt = jnp.zeros((in_dim, GT_W), jnp.float32)
    w_gt = w_gt.at[:, 0:100].set(params["wg"])
    w_gt = w_gt.at[:, 128:228].set(params["wt"])
    b_gt = jnp.zeros((1, GT_W), jnp.float32)
    b_gt = b_gt.at[:, 0:100].set(params["bg"])
    b_gt = b_gt.at[:, 128:228].set(params["bt"])
    # 2-way weight_softmax -> single logit-difference column
    w_wsd = params["wws"][:, 0:1] - params["wws"][:, 1:2]
    b_wsd = params["bws"][:, 0:1] - params["bws"][:, 1:2]

    mats = {"gt": w_gt, "w": params["ww"], "wsd": w_wsd,
            "lc": params["wlc"], "n1": params["wn1"], "n2": params["wn2"]}
    w_slab = jnp.zeros((total_rows, slab_w), weight_dtype)
    for name, _ in segs:
        m = mats[name]
        w_slab = w_slab.at[row_off[name]:row_off[name] + m.shape[0],
                           0:m.shape[1]].set(m.astype(weight_dtype))

    biases = [b_gt, params["bw"], b_wsd, params["blc"], params["bn1"], params["bn2"]]
    b_slab = jnp.zeros((8, slab_w), jnp.float32)
    for j, b in enumerate(biases):
        b_slab = b_slab.at[j:j + 1, 0:b.shape[1]].set(b.astype(jnp.float32))

    return w_slab, b_slab, row_off


def _default_block_b():
    """Batch tile: smaller on 64 MiB-VMEM parts (v7x), bigger on v5e/v6e."""
    try:
        vmem = getattr(pltpu.get_tpu_info(), "vmem_capacity_bytes", 0) or 0
    except Exception:  # pragma: no cover - defensive
        vmem = 0
    if vmem and vmem <= 64 * 1024 * 1024:
        return 1024
    return 2048


def init_lp_params(key, in_dim, network_numbers, dtype=jnp.float32):
    """Deterministic parameter init (uniform +-1/sqrt(fan_in), PyTorch-style)."""
    ks = jax.random.split(key, 14)

    def u(k, shape, fan_in):
        bound = 1.0 / jnp.sqrt(jnp.asarray(fan_in, dtype))
        return jax.random.uniform(k, shape, dtype, -bound, bound)

    return dict(
        wg=u(ks[0], (in_dim, 100), in_dim),       bg=u(ks[1], (1, 100), in_dim),
        wt=u(ks[2], (in_dim, 100), in_dim),       bt=u(ks[3], (1, 100), in_dim),
        ww=u(ks[4], (in_dim + 1, 100), in_dim + 1), bw=u(ks[5], (1, 100), in_dim + 1),
        wws=u(ks[6], (100, 2), 100),              bws=u(ks[7], (1, 2), 100),
        wlc=u(ks[8], (100, 2), 100),              blc=u(ks[9], (1, 2), 100),
        wn1=u(ks[10], (100, 60), 100),            bn1=u(ks[11], (1, 60), 100),
        wn2=u(ks[12], (60, network_numbers), 60),
        bn2=u(ks[13], (1, network_numbers), 60),
    )


def lp_forward(edge_embbing, weight_input, params, coeff=1.0, block_b=None):
    """edge_embbing: (B, 1, in_dim), weight_input: (B, 1, in_dim+1).  L == 1."""
    del coeff  # grad_reverse coeff only affects the backward pass
    B = edge_embbing.shape[0]
    in_dim = edge_embbing.shape[-1]
    n_out = params["wn2"].shape[1]
    out_w = 2 + n_out

    x = edge_embbing.reshape(B, in_dim)
    wi = weight_input.reshape(B, in_dim + 1)

    if block_b is None:
        block_b = _default_block_b()
    tb = min(_round_up(block_b, 16), _round_up(B, 16))   # batch tile (mult of 16)
    b_pad = _round_up(B, tb)
    if b_pad != B:
        x = jnp.pad(x, ((0, b_pad - B), (0, 0)))
        wi = jnp.pad(wi, ((0, b_pad - B), (0, 0)))
    x = x.astype(jnp.bfloat16)
    wi = wi.astype(jnp.bfloat16)

    w_slab, b_slab, row_off = _pack_params(params, in_dim, n_out)
    kernel = _make_lp_kernel(in_dim, n_out, row_off)

    flops = 2 * b_pad * (in_dim * 256 + (in_dim + 1) * 100
                         + 100 * (1 + 2 + 60) + 60 * n_out)
    transcendentals = b_pad * (1 + 2 + n_out)
    bytes_accessed = (int(x.size) * 2 + int(wi.size) * 2
                      + int(w_slab.size) * 2 + int(b_slab.size) * 4
                      + b_pad * out_w * 4)

    out = pl.pallas_call(
        kernel,
        out_shape=jax.ShapeDtypeStruct((b_pad, out_w), jnp.float32),
        grid_spec=pltpu.PrefetchScalarGridSpec(
            num_scalar_prefetch=0,
            grid=(b_pad // tb,),
            in_specs=[
                pl.BlockSpec((tb, in_dim), lambda i: (i, 0)),
                pl.BlockSpec((tb, in_dim + 1), lambda i: (i, 0)),
                # packed weights / biases stay VMEM-resident across the grid
                pl.BlockSpec(w_slab.shape, lambda i: (0, 0)),
                pl.BlockSpec(b_slab.shape, lambda i: (0, 0)),
            ],
            out_specs=pl.BlockSpec((tb, out_w), lambda i: (i, 0)),
        ),
        compiler_params=pltpu.CompilerParams(
            dimension_semantics=("parallel",),      # v7x: shard batch over 2 TCs
            vmem_limit_bytes=32 * 1024 * 1024,
        ),
        cost_estimate=pl.CostEstimate(
            flops=flops, transcendentals=transcendentals,
            bytes_accessed=bytes_accessed),
    )(x, wi, w_slab, b_slab)

    return out[:B, 0:2], out[:B, 2:2 + n_out]


def lp_reference(edge_embbing, weight_input, params):
    """Pure-JAX f32 reference matching the PyTorch forward."""
    B = edge_embbing.shape[0]
    x = edge_embbing.reshape(B, -1).astype(jnp.float32)
    wi = weight_input.reshape(B, -1).astype(jnp.float32)
    gen = jax.nn.relu(x @ params["wg"] + params["bg"])
    tgt = jax.nn.relu(x @ params["wt"] + params["bt"])
    wfeat = jax.nn.relu(wi @ params["ww"] + params["bw"])
    wout = jax.nn.softmax(wfeat @ params["wws"] + params["bws"], axis=1)
    feature = gen * wout[:, 0:1] + tgt * wout[:, 1:2]
    link = jax.nn.softmax(feature @ params["wlc"] + params["blc"], axis=1)
    h = jax.nn.relu(gen @ params["wn1"] + params["bn1"])
    net = jax.nn.softmax(h @ params["wn2"] + params["bn2"], axis=1)
    return link, net


if __name__ == "__main__":
    B, in_dim, network_numbers = 8, 32, 6
    key = jax.random.PRNGKey(0)
    k_x, k_w, k_p = jax.random.split(key, 3)

    edge_embbing = jax.random.normal(k_x, (B, 1, in_dim), jnp.float32)
    weight_input = jax.random.normal(k_w, (B, 1, in_dim + 1), jnp.float32)
    params = init_lp_params(k_p, in_dim, network_numbers)

    link_out, net_out = lp_forward(edge_embbing, weight_input, params)
    jax.block_until_ready((link_out, net_out))

    assert link_out.shape == (B, 2)
    assert net_out.shape == (B, network_numbers)
    # softmax rows should sum to ~1 (approx reciprocal + bf16 tolerance)
    assert jnp.allclose(jnp.sum(link_out, axis=1), 1.0, atol=1e-2)
    assert jnp.allclose(jnp.sum(net_out, axis=1), 1.0, atol=1e-2)

    # compare against the pure-JAX f32 reference (bf16 weights -> small drift)
    link_ref, net_ref = lp_reference(edge_embbing, weight_input, params)
    assert jnp.allclose(link_out, link_ref, atol=5e-2)
    assert jnp.allclose(net_out, net_ref, atol=5e-2)
    print("KERNEL_OK")
</pallas_src>

<mosaic_0001>
module attributes {stable_mosaic.version = 11 : i64} {
  func.func @kernel(%arg0: i32, %arg1: memref<16x32xbf16, #tpu.memory_space<vmem>>, %arg2: memref<16x33xbf16, #tpu.memory_space<vmem>>, %arg3: memref<480x256xbf16, #tpu.memory_space<vmem>>, %arg4: memref<8x256xf32, #tpu.memory_space<vmem>>, %arg5: memref<16x8xf32, #tpu.memory_space<vmem>>) attributes {dimension_semantics = [#tpu.dimension_semantics<parallel>], iteration_bounds = array<i64: 1>, scalar_prefetch = 0 : i64, scratch_operands = 0 : i64, tpu.core_type = #tpu.core_type<tc>, window_params = [{transform_indices = @transform_0, window_bounds = array<i64: 16, 32>}, {transform_indices = @transform_1, window_bounds = array<i64: 16, 33>}, {pipeline_mode = #tpu.pipeline_mode<synchronous>, transform_indices = @transform_2, window_bounds = array<i64: 480, 256>}, {pipeline_mode = #tpu.pipeline_mode<synchronous>, transform_indices = @transform_3, window_bounds = array<i64: 8, 256>}, {transform_indices = @transform_4, window_bounds = array<i64: 16, 8>}]} {
    %c0 = arith.constant 0 : index
    %c0_0 = arith.constant 0 : index
    %0 = vector.load %arg1[%c0, %c0_0] : memref<16x32xbf16, #tpu.memory_space<vmem>>, vector<16x32xbf16>
    %c0_1 = arith.constant 0 : index
    %c0_2 = arith.constant 0 : index
    %1 = vector.load %arg2[%c0_1, %c0_2] : memref<16x33xbf16, #tpu.memory_space<vmem>>, vector<16x33xbf16>
    %c0_3 = arith.constant 0 : index
    %c0_4 = arith.constant 0 : index
    %2 = vector.load %arg3[%c0_3, %c0_4] : memref<480x256xbf16, #tpu.memory_space<vmem>>, vector<32x256xbf16>
    %cst = arith.constant dense<0.000000e+00> : vector<16x256xf32>
    %3 = tpu.matmul %0, %2, %cst {dimension_numbers = #tpu.dot_dimension_numbers<[1], [0], [0], [1], [0, 0, 1, 1], [], []>} : vector<16x32xbf16>, vector<32x256xbf16>, vector<16x256xf32> -> vector<16x256xf32>
    %c0_5 = arith.constant 0 : index
    %c0_6 = arith.constant 0 : index
    %4 = vector.load %arg4[%c0_5, %c0_6] : memref<8x256xf32, #tpu.memory_space<vmem>>, vector<1x256xf32>
    %5 = vector.broadcast %4 : vector<1x256xf32> to vector<16x256xf32>
    %6 = arith.addf %3, %5 : vector<16x256xf32>
    %cst_7 = arith.constant 0.000000e+00 : f32
    %7 = vector.broadcast %cst_7 : f32 to vector<16x256xf32>
    %8 = arith.maximumf %6, %7 : vector<16x256xf32>
    %9 = vector.extract_strided_slice %8 {offsets = [0, 0], sizes = [16, 100], strides = [1, 1]} : vector<16x256xf32> to vector<16x100xf32>
    %10 = vector.extract_strided_slice %8 {offsets = [0, 128], sizes = [16, 100], strides = [1, 1]} : vector<16x256xf32> to vector<16x100xf32>
    %c32 = arith.constant 32 : index
    %c0_8 = arith.constant 0 : index
    %11 = vector.load %arg3[%c32, %c0_8] : memref<480x256xbf16, #tpu.memory_space<vmem>>, vector<33x100xbf16>
    %cst_9 = arith.constant dense<0.000000e+00> : vector<16x100xf32>
    %12 = tpu.matmul %1, %11, %cst_9 {dimension_numbers = #tpu.dot_dimension_numbers<[1], [0], [0], [1], [0, 0, 1, 1], [], []>} : vector<16x33xbf16>, vector<33x100xbf16>, vector<16x100xf32> -> vector<16x100xf32>
    %c1 = arith.constant 1 : index
    %c0_10 = arith.constant 0 : index
    %13 = vector.load %arg4[%c1, %c0_10] : memref<8x256xf32, #tpu.memory_space<vmem>>, vector<1x100xf32>
    %14 = vector.broadcast %13 : vector<1x100xf32> to vector<16x100xf32>
    %15 = arith.addf %12, %14 : vector<16x100xf32>
    %cst_11 = arith.constant 0.000000e+00 : f32
    %16 = vector.broadcast %cst_11 : f32 to vector<16x100xf32>
    %17 = arith.maximumf %15, %16 : vector<16x100xf32>
    %c80 = arith.constant 80 : index
    %c0_12 = arith.constant 0 : index
    %18 = vector.load %arg3[%c80, %c0_12] : memref<480x256xbf16, #tpu.memory_space<vmem>>, vector<100x1xbf16>
    %19 = arith.truncf %17 : vector<16x100xf32> to vector<16x100xbf16>
    %cst_13 = arith.constant dense<0.000000e+00> : vector<16x1xf32>
    %20 = tpu.matmul %19, %18, %cst_13 {dimension_numbers = #tpu.dot_dimension_numbers<[1], [0], [0], [1], [0, 0, 1, 1], [], []>} : vector<16x100xbf16>, vector<100x1xbf16>, vector<16x1xf32> -> vector<16x1xf32>
    %c2 = arith.constant 2 : index
    %c0_14 = arith.constant 0 : index
    %21 = vector.load %arg4[%c2, %c0_14] : memref<8x256xf32, #tpu.memory_space<vmem>>, vector<1x1xf32>
    %22 = vector.broadcast %21 : vector<1x1xf32> to vector<16x1xf32>
    %23 = arith.addf %20, %22 : vector<16x1xf32>
    %cst_15 = arith.constant 0.000000e+00 : f32
    %24 = vector.broadcast %cst_15 : f32 to vector<16x1xf32>
    %25 = arith.subf %24, %23 : vector<16x1xf32>
    %26 = math.exp %25 : vector<16x1xf32>
    %cst_16 = arith.constant 1.000000e+00 : f32
    %27 = vector.broadcast %cst_16 : f32 to vector<16x1xf32>
    %28 = arith.addf %27, %26 : vector<16x1xf32>
    %29 = tpu.reciprocal %28 {approx = true} : vector<16x1xf32> -> vector<16x1xf32>
    %30 = vector.broadcast %29 : vector<16x1xf32> to vector<16x100xf32>
    %31 = arith.mulf %9, %30 : vector<16x100xf32>
    %cst_17 = arith.constant 1.000000e+00 : f32
    %32 = vector.broadcast %cst_17 : f32 to vector<16x1xf32>
    %33 = arith.subf %32, %29 : vector<16x1xf32>
    %34 = vector.broadcast %33 : vector<16x1xf32> to vector<16x100xf32>
    %35 = arith.mulf %10, %34 : vector<16x100xf32>
    %36 = arith.addf %31, %35 : vector<16x100xf32>
    %c192 = arith.constant 192 : index
    %c0_18 = arith.constant 0 : index
    %37 = vector.load %arg3[%c192, %c0_18] : memref<480x256xbf16, #tpu.memory_space<vmem>>, vector<100x2xbf16>
    %38 = arith.truncf %36 : vector<16x100xf32> to vector<16x100xbf16>
    %cst_19 = arith.constant dense<0.000000e+00> : vector<16x2xf32>
    %39 = tpu.matmul %38, %37, %cst_19 {dimension_numbers = #tpu.dot_dimension_numbers<[1], [0], [0], [1], [0, 0, 1, 1], [], []>} : vector<16x100xbf16>, vector<100x2xbf16>, vector<16x2xf32> -> vector<16x2xf32>
    %c3 = arith.constant 3 : index
    %c0_20 = arith.constant 0 : index
    %40 = vector.load %arg4[%c3, %c0_20] : memref<8x256xf32, #tpu.memory_space<vmem>>, vector<1x2xf32>
    %41 = vector.broadcast %40 : vector<1x2xf32> to vector<16x2xf32>
    %42 = arith.addf %39, %41 : vector<16x2xf32>
    %cst_21 = arith.constant dense<0xFF800000> : vector<16xf32>
    %43 = vector.multi_reduction <maximumf>, %42, %cst_21 [1] : vector<16x2xf32> to vector<16xf32>
    %44 = vector.shape_cast %43 : vector<16xf32> to vector<16x1xf32>
    %45 = vector.broadcast %44 : vector<16x1xf32> to vector<16x2xf32>
    %46 = arith.subf %42, %45 : vector<16x2xf32>
    %47 = math.exp %46 : vector<16x2xf32>
    %cst_22 = arith.constant dense<0.000000e+00> : vector<16xf32>
    %48 = vector.multi_reduction <add>, %47, %cst_22 [1] : vector<16x2xf32> to vector<16xf32>
    %49 = vector.shape_cast %48 : vector<16xf32> to vector<16x1xf32>
    %50 = tpu.reciprocal %49 {approx = true} : vector<16x1xf32> -> vector<16x1xf32>
    %51 = vector.broadcast %50 : vector<16x1xf32> to vector<16x2xf32>
    %52 = arith.mulf %47, %51 : vector<16x2xf32>
    %c304 = arith.constant 304 : index
    %c0_23 = arith.constant 0 : index
    %53 = vector.load %arg3[%c304, %c0_23] : memref<480x256xbf16, #tpu.memory_space<vmem>>, vector<100x60xbf16>
    %54 = arith.truncf %9 : vector<16x100xf32> to vector<16x100xbf16>
    %cst_24 = arith.constant dense<0.000000e+00> : vector<16x60xf32>
    %55 = tpu.matmul %54, %53, %cst_24 {dimension_numbers = #tpu.dot_dimension_numbers<[1], [0], [0], [1], [0, 0, 1, 1], [], []>} : vector<16x100xbf16>, vector<100x60xbf16>, vector<16x60xf32> -> vector<16x60xf32>
    %c4 = arith.constant 4 : index
    %c0_25 = arith.constant 0 : index
    %56 = vector.load %arg4[%c4, %c0_25] : memref<8x256xf32, #tpu.memory_space<vmem>>, vector<1x60xf32>
    %57 = vector.broadcast %56 : vector<1x60xf32> to vector<16x60xf32>
    %58 = arith.addf %55, %57 : vector<16x60xf32>
    %cst_26 = arith.constant 0.000000e+00 : f32
    %59 = vector.broadcast %cst_26 : f32 to vector<16x60xf32>
    %60 = arith.maximumf %58, %59 : vector<16x60xf32>
    %c416 = arith.constant 416 : index
    %c0_27 = arith.constant 0 : index
    %61 = vector.load %arg3[%c416, %c0_27] : memref<480x256xbf16, #tpu.memory_space<vmem>>, vector<60x6xbf16>
    %62 = arith.truncf %60 : vector<16x60xf32> to vector<16x60xbf16>
    %cst_28 = arith.constant dense<0.000000e+00> : vector<16x6xf32>
    %63 = tpu.matmul %62, %61, %cst_28 {dimension_numbers = #tpu.dot_dimension_numbers<[1], [0], [0], [1], [0, 0, 1, 1], [], []>} : vector<16x60xbf16>, vector<60x6xbf16>, vector<16x6xf32> -> vector<16x6xf32>
    %c5 = arith.constant 5 : index
    %c0_29 = arith.constant 0 : index
    %64 = vector.load %arg4[%c5, %c0_29] : memref<8x256xf32, #tpu.memory_space<vmem>>, vector<1x6xf32>
    %65 = vector.broadcast %64 : vector<1x6xf32> to vector<16x6xf32>
    %66 = arith.addf %63, %65 : vector<16x6xf32>
    %cst_30 = arith.constant dense<0xFF800000> : vector<16xf32>
    %67 = vector.multi_reduction <maximumf>, %66, %cst_30 [1] : vector<16x6xf32> to vector<16xf32>
    %68 = vector.shape_cast %67 : vector<16xf32> to vector<16x1xf32>
    %69 = vector.broadcast %68 : vector<16x1xf32> to vector<16x6xf32>
    %70 = arith.subf %66, %69 : vector<16x6xf32>
    %71 = math.exp %70 : vector<16x6xf32>
    %cst_31 = arith.constant dense<0.000000e+00> : vector<16xf32>
    %72 = vector.multi_reduction <add>, %71, %cst_31 [1] : vector<16x6xf32> to vector<16xf32>
    %73 = vector.shape_cast %72 : vector<16xf32> to vector<16x1xf32>
    %74 = tpu.reciprocal %73 {approx = true} : vector<16x1xf32> -> vector<16x1xf32>
    %75 = vector.broadcast %74 : vector<16x1xf32> to vector<16x6xf32>
    %76 = arith.mulf %71, %75 : vector<16x6xf32>
    %c0_32 = arith.constant 0 : index
    %c0_33 = arith.constant 0 : index
    %77 = vector.load %arg5[%c0_32, %c0_33] : memref<16x8xf32, #tpu.memory_space<vmem>>, vector<16x2xf32>
    tpu.vector_store %arg5[%c0_32, %c0_33], %52 {strides = array<i32>} : memref<16x8xf32, #tpu.memory_space<vmem>>, vector<16x2xf32>,
    %c0_34 = arith.constant 0 : index
    %c2_35 = arith.constant 2 : index
    %78 = vector.load %arg5[%c0_34, %c2_35] : memref<16x8xf32, #tpu.memory_space<vmem>>, vector<16x6xf32>
    tpu.vector_store %arg5[%c0_34, %c2_35], %76 {strides = array<i32>} : memref<16x8xf32, #tpu.memory_space<vmem>>, vector<16x6xf32>,
    return
  }
  func.func @transform_0(%arg0: i32) -> (i32, i32) {
    %c0_i32 = arith.constant 0 : i32
    %c0_i32_0 = arith.constant 0 : i32
    return %arg0, %c0_i32 : i32, i32
  }
  func.func @transform_1(%arg0: i32) -> (i32, i32) {
    %c0_i32 = arith.constant 0 : i32
    %c0_i32_0 = arith.constant 0 : i32
    return %arg0, %c0_i32 : i32, i32
  }
  func.func @transform_2(%arg0: i32) -> (i32, i32) {
    %c0_i32 = arith.constant 0 : i32
    %c0_i32_0 = arith.constant 0 : i32
    %c0_i32_1 = arith.constant 0 : i32
    return %c0_i32, %c0_i32_0 : i32, i32
  }
  func.func @transform_3(%arg0: i32) -> (i32, i32) {
    %c0_i32 = arith.constant 0 : i32
    %c0_i32_0 = arith.constant 0 : i32
    %c0_i32_1 = arith.constant 0 : i32
    return %c0_i32, %c0_i32_0 : i32, i32
  }
  func.func @transform_4(%arg0: i32) -> (i32, i32) {
    %c0_i32 = arith.constant 0 : i32
    %c0_i32_0 = arith.constant 0 : i32
    return %arg0, %c0_i32 : i32, i32
  }
}

</mosaic_0001>

<bundles_post_ra>
// kernel: tpu_custom_call.1
= control target key start
LH: loop header
LB: loop body
LE: loop exit
PB: predicated region body
PF: predicated region fallthrough
CT: control target
= control target key end

     0   :  { %9 = vsyncpa [#allocation3], 0  ;;  %s1184_s0 = inlined_call_operand.hbm [shape: bf16[16,32], index: 0, kind: input, shape index: {}]   ;;  %s1185_s1 = inlined_call_operand.hbm [shape: bf16[16,33], index: 1, kind: input, shape index: {}]   ;;  %s1186_s2 = inlined_call_operand.hbm [shape: bf16[480,256], index: 2, kind: input, shape index: {}]   ;;  %s1187_s3 = inlined_call_operand.hbm [shape: f32[8,256], index: 3, kind: input, shape index: {}]   ;;  %s1188_s4 = inlined_call_operand.vmem [shape: f32[16,8], index: 4, kind: output, shape index: {}]  }
   0x1   :  { %10 = vsyncpa [#allocation5], 0 }
   0x2   :  { %11 = vsyncpa [#allocation8], 0  ;;  %s1048_s15 = smov [#allocation4]   ;;  %s1049_s17 = smov [#allocation2]  }
   0x3   :  { %s29_s16 = sshll.u32 %s1048_s15, 4  ;;  %s17_s18 = sshll.u32 %s1049_s17, 4  ;;  %s30_s16 = int_to_ptr.vmem [resolvable:$true] %s29_s16  ;;  %s18_s18 = int_to_ptr.vmem [resolvable:$true] %s17_s18 }
   0x4   :  { %s970_s19 = scalar_lea.vmem %s30_s16, 128  ;;  %p975_p1 = scmp.lt.s32.totalorder %s30_s16, %s30_s16 }
   0x5   :  { %p971_p0 = scmp.ne.s32.totalorder %s30_s16, %s970_s19  ;;  %p976_p2 = scmp.lt.s32.totalorder %s970_s19, %s970_s19 }
   0x7   :  { %p977_p3 = por %p976_p2, %p975_p1 }
   0x9   :  { %p978_p4 = pnand %p977_p3, %p971_p0 }
   0xb   :  { %981 = shalt.err (!%p978_p4)
}
   0xc   :  { %s1050_s20 = smov 64   ;;  %s1051_s21 = smov 4  }
   0xd   :  { %35 = dma.hbm_to_vmem [thread:$0]  %s1185_s1, 128, %s30_s16, [#allocation5], %s1050_s20, %s1050_s20, %s1051_s21  }
   0xe   :  { %s990_s24 = scalar_lea.vmem %s18_s18, 128  ;;  %p995_p6 = scmp.lt.s32.totalorder %s18_s18, %s18_s18 }
   0xf   :  { %p991_p5 = scmp.ne.s32.totalorder %s18_s18, %s990_s24  ;;  %p996_p7 = scmp.lt.s32.totalorder %s990_s24, %s990_s24 }
  0x11   :  { %p997_p8 = por %p996_p7, %p995_p6 }
  0x13   :  { %p998_p9 = pnand %p997_p8, %p991_p5 }
  0x15   :  { %1001 = shalt.err (!%p998_p9)
}
  0x16   :  { %23 = dma.hbm_to_vmem [thread:$0]  %s1184_s0, 128, %s18_s18, [#allocation3], %s1050_s20, %s1050_s20, %s1051_s21  }
  0x17   :  { %s1052_s27 = smov [#allocation6]  }
  0x18   :  { %s41_s28 = sshll.u32 %s1052_s27, 4  ;;  %s42_s28 = int_to_ptr.vmem [resolvable:$true] %s41_s28 }
  0x19   :  { %s1010_s29 = scalar_lea.vmem %s42_s28, 7680  ;;  %p1015_p11 = scmp.lt.s32.totalorder %s42_s28, %s42_s28 }
  0x1a   :  { %p1011_p10 = scmp.ne.s32.totalorder %s42_s28, %s1010_s29  ;;  %p1016_p12 = scmp.lt.s32.totalorder %s1010_s29, %s1010_s29 }
  0x1c   :  { %p1017_p13 = por %p1016_p12, %p1015_p11 }
  0x1e   :  { %p1018_p0 = pnand %p1017_p13, %p1011_p10 }
  0x20   :  { %1021 = shalt.err (!%p1018_p0)
}
  0x21   :  { %s1053_s1 = smov 128   ;;  %s1054_s30 = smov 8  }
  0x22   :  { %47 = dma.hbm_to_vmem [thread:$0]  %s1186_s2, 7680, %s42_s28, [#allocation5], %s1053_s1, %s1053_s1, %s1054_s30  }
  0x23   :  { %s1055_s7 = smov [#allocation7]  }
  0x24   :  { %s54_s8 = sshll.u32 %s1055_s7, 4  ;;  %s55_s8 = int_to_ptr.vmem [resolvable:$true] %s54_s8 }
  0x25   :  { %s1030_s0 = scalar_lea.vmem %s55_s8, 256  ;;  %p1035_p2 = scmp.lt.s32.totalorder %s55_s8, %s55_s8 }
  0x26   :  { %p1031_p1 = scmp.ne.s32.totalorder %s55_s8, %s1030_s0  ;;  %p1036_p3 = scmp.lt.s32.totalorder %s1030_s0, %s1030_s0 }
  0x28   :  { %p1037_p4 = por %p1036_p3, %p1035_p2 }
  0x2a   :  { %p1038_p5 = pnand %p1037_p4, %p1031_p1 }
  0x2c   :  { %1041 = shalt.err (!%p1038_p5)
}
  0x2d   :  { %57 = dma.hbm_to_vmem [thread:$0]  %s1187_s3, 256, %s55_s8, [#allocation8]  }
  0x2e   :  { %1042 = dma.done.wait [#allocation3], 128  }
  0x2f   :  { %1043 = vsyncadd [#allocation3], 4294967168 }
  0x30   :  { %1044 = dma.done.wait [#allocation5], 7808  }
  0x31   :  { %1045 = vsyncadd [#allocation5], 4294959488 }
  0x32   :  { %1046 = dma.done.wait [#allocation8], 256  }
  0x33   :  { %1047 = vsyncadd [#allocation8], 4294967040  ;;  %v1056_v0 = vmov 0.0   ;;  %vm1057_vm0 = vmmov 0   ;;  %v1058_v1 = vmov 0   ;;  %vm197_vm1 = vcmask 1040384  }
  0x34   :  { %812 = vmatprep.subr.bf16.mxu1 %v1056_v0  ;;  %818 = vmatprep.mubr.msk.bf16.mxu1 %vm1057_vm0, %v1056_v0  ;;  %v199_v2 = vsel %vm197_vm1, 65535, %v1058_v1  ;;  %v902_v3 = vld [vmem:[#allocation6 + $0x40] ss:$0 sps:$4 sm:$0x11]   ;;  %v903_v5 = vld [vmem:[#allocation6 + $0x30] ss:$8 sps:$4 sm:$0xff]   ;;  %v81_v21 = vlaneseq }
  0x35   :  { %152 = vmatprep.mubr.bf16.mxu0 %v1058_v1  ;;  %900 = vset.pattern.permute.xlu0 %v1058_v1  ;;  %v201_v4 = vand.u32 %v902_v3, %v199_v2  ;;  %v906_v6 = vld [vmem:[#allocation6 + $0x14] ss:$8 sps:$4 sm:$0xff]   ;;  %v908_v7 = vld [vmem:[#allocation6 + $0x10] ss:$8 sps:$4 sm:$0xff]   ;;  %v909_v8 = vld [vmem:[#allocation6 + $0x4] ss:$8 sps:$4 sm:$0xff]  }
  0x36   :  { %901 = vset.pattern.permute.xlu1 %v1058_v1  ;;  %132 = vmatprep.subr.bf16.mxu0 %v906_v6  ;;  %v911_v9 = vld [vmem:[#allocation6] ss:$8 sps:$4 sm:$0xff]   ;;  %v913_v10 = vld [vmem:[#allocation6 + $0xb0] ss:$0 sps:$4 sm:$0x33]   ;;  %vm304_vm2 = vcmask 1041408  }
  0x37   :  { %813 = vmatpush3.bf16.msra.mxu1 %v201_v4  ;;  %133 = vmatpush1.bf16.msra.mxu0 %v908_v7  ;;  %v904_v11 = vld [vmem:[#allocation6 + $0x20] ss:$8 sps:$4 sm:$0xff]   ;;  %v912_v12 = vld [vmem:[#allocation2] sm:$0xff]   ;;  %v905_v13 = vld [vmem:[#allocation4] sm:$0xff]   ;;  %vm193_vm3 = vcmask 269312   ;;  %vm116_vm4 = vcmask 261120  }
  0x38   :  { %814 = vmatprep.subr.bf16.mxu1 %v1056_v0  ;;  %134 = vmatprep.subr.bf16.mxu0 %v909_v8  ;;  %v306_v14 = vsel %vm304_vm2, %v913_v10, 0  ;;  %v914_v15 = vld [vmem:[#allocation6 + $0xa0] ss:$8 sps:$4 sm:$0xff]   ;;  %v915_v16 = vld [vmem:[#allocation6 + $0x90] ss:$8 sps:$4 sm:$0xff]   ;;  %v82_v22 = vshrl.u32 %v81_v21, 7 }
  0x39   :  { %v916_v17 = vld [vmem:[#allocation6 + $0x80] ss:$8 sps:$4 sm:$0xff]   ;;  %v917_v18 = vld [vmem:[#allocation6 + $0x70] ss:$8 sps:$4 sm:$0xff]   ;;  %vm300_vm5 = vcmask 818176   ;;  %vm651_vm6 = vcmask 1045504  }
  0x3a   :  { %v918_v19 = vld [vmem:[#allocation6 + $0x60] ss:$8 sps:$4 sm:$0xff]   ;;  %v919_v20 = vld [vmem:[#allocation6 + $0x50] ss:$8 sps:$4 sm:$0xff]   ;;  %v87_v23 = vsub.s32 1, %v82_v22  ;;  %v83_v43 = vsub.s32 0, %v82_v22 }
  0x3b   :  { %815 = vmatpush3.bf16.msra.mxu1 %v903_v5  ;;  %135 = vmatpush1.bf16.msra.mxu0 %v911_v9  ;;  %v79_v24 = vld [vmem:[#allocation7] ss:$8 sm:$0x3]  ;;  %v172_v27 = vld [vmem:[#allocation7 + $0x1] ss:$0 sm:$0xff]  ;;  %vm647_vm7 = vcmask 490496  }
  0x3c   :  { %816 = vmatprep.subr.bf16.mxu1 %v1056_v0  ;;  %822 = vmatprep.subr.bf16.mxu0 %v1056_v0  ;;  %v1116_v25 = vrot.slane %v79_v24, %v87_v23  ;;  %v920_v35 = vld [vmem:[#allocation6 + $0x190] ss:$0 sps:$4 sm:$0x33]   ;;  %v921_v41 = vld [vmem:[#allocation6 + $0x180] ss:$8 sps:$4 sm:$0xff]   ;;  %v84_v45 = vrot.slane %v79_v24, %v83_v43  ;;  %vm696_vm8 = vcmask 48128  }
  0x3d   :  { %v569_v40 = vsel %vm304_vm2, %v920_v35, 0  ;;  %v922_v42 = vld [vmem:[#allocation6 + $0x170] ss:$8 sps:$4 sm:$0xff]   ;;  %v923_v44 = vld [vmem:[#allocation6 + $0x160] ss:$8 sps:$4 sm:$0xff]   ;;  %vm488_vm9 = vcmask 15360  }
  0x3e   :  { %744 = vmatmul.mubr.msk.bf16.vlgmr.msra.gmra.mxu0 %vm116_vm4, %v912_v12  ;;  %v924_v46 = vld [vmem:[#allocation6 + $0x150] ss:$8 sps:$4 sm:$0xff]   ;;  %v925_v50 = vld [vmem:[#allocation6 + $0x140] ss:$8 sps:$4 sm:$0xff]   ;;  %v525_v23 = vld [vmem:[#allocation7 + $0x4] ss:$0 sm:$0xff] }
  0x3f   :  { %817 = vmatpush3.bf16.msra.mxu1 %v904_v11  ;;  %823 = vmatpush3.bf16.msra.mxu0 %v306_v14  ;;  %v926_v53 = vld [vmem:[#allocation6 + $0x130] ss:$8 sps:$4 sm:$0xff]   ;;  %v927_v55 = vld [vmem:[#allocation6 + $0x120] ss:$0 sps:$4 sm:$0x33]   ;;  %s1059_s2 = smov 2  }
  0x40   :  { %840 = vmatprep.subr.bf16.mxu1 %v1056_v0  ;;  %824 = vmatprep.subr.bf16.mxu0 %v1056_v0  ;;  %v445_v56 = vsel %vm304_vm2, %v927_v55, 0  ;;  %v928_v57 = vld [vmem:[#allocation6 + $0x110] ss:$8 sps:$4 sm:$0xff]   ;;  %v929_v58 = vld [vmem:[#allocation6 + $0x100] ss:$8 sps:$4 sm:$0xff]   ;;  %vm729_vm10 = vcmask 64528  }
  0x41   :  { %836 = vmatprep.mubr.msk.bf16.mxu0 %vm1057_vm0, %v1056_v0  ;;  %v930_v59 = vld [vmem:[#allocation6 + $0xf0] ss:$8 sps:$4 sm:$0xff]   ;;  %v260_v61 = vld [vmem:[#allocation7 + $0x2] ss:$0 sm:$0xff] }
  0x42   :  { %819 = vmatmul.mubr.msk.bf16.vlgmr.msra.gmra.mxu1 %vm193_vm3, %v905_v13  ;;  %v931_v13 = vld [vmem:[#allocation6 + $0xe0] ss:$8 sps:$4 sm:$0xff]   ;;  %v932_v14 = vld [vmem:[#allocation6 + $0xd0] ss:$8 sps:$4 sm:$0xff]  }
  0x43   :  { %854 = vmatprep.mubr.msk.bf16.mxu1 %vm1057_vm0, %v1056_v0  ;;  %825 = vmatpush3.bf16.msra.mxu0 %v914_v15  ;;  %v934_v43 = vld [vmem:[#allocation6 + $0x1d0] ss:$8 sps:$4 sm:$0x3f]  }
  0x44   :  { %826 = vmatprep.subr.bf16.mxu0 %v1056_v0  ;;  %841 = vmatpush3.bf16.msra.mxu1 %v445_v56 }
  0x45   :  { %842 = vmatprep.subr.bf16.mxu1 %v1056_v0 }
  0x47   :  { %827 = vmatpush3.bf16.msra.mxu0 %v915_v16 }
  0x48   :  { %828 = vmatprep.subr.bf16.mxu0 %v1056_v0  ;;  %843 = vmatpush3.bf16.msra.mxu1 %v928_v57 }
  0x49   :  { %844 = vmatprep.subr.bf16.mxu1 %v1056_v0 }
  0x4b   :  { %829 = vmatpush3.bf16.msra.mxu0 %v916_v17 }
  0x4c   :  { %830 = vmatprep.subr.bf16.mxu0 %v1056_v0  ;;  %845 = vmatpush3.bf16.msra.mxu1 %v929_v58 }
  0x4d   :  { %846 = vmatprep.subr.bf16.mxu1 %v1056_v0 }
  0x4f   :  { %831 = vmatpush3.bf16.msra.mxu0 %v917_v18  ;;  %v933_v18 = vld [vmem:[#allocation6 + $0xc0] ss:$8 sps:$4 sm:$0xff]  }
  0x50   :  { %832 = vmatprep.subr.bf16.mxu0 %v1056_v0  ;;  %847 = vmatpush3.bf16.msra.mxu1 %v930_v59 }
  0x51   :  { %848 = vmatprep.subr.bf16.mxu1 %v1056_v0 }
  0x53   :  { %833 = vmatpush3.bf16.msra.mxu0 %v918_v19 }
  0x54   :  { %834 = vmatprep.subr.bf16.mxu0 %v1056_v0  ;;  %849 = vmatpush3.bf16.msra.mxu1 %v931_v13 }
  0x55   :  { %850 = vmatprep.subr.bf16.mxu1 %v1056_v0 }
  0x57   :  { %835 = vmatpush3.bf16.msra.mxu0 %v919_v20 }
  0x58   :  { %858 = vmatprep.subr.bf16.mxu0 %v1056_v0  ;;  %851 = vmatpush3.bf16.msra.mxu1 %v932_v14 }
  0x59   :  { %852 = vmatprep.subr.bf16.mxu1 %v1056_v0 }
  0x5c   :  { %853 = vmatpush3.bf16.msra.mxu1 %v933_v18 }
  0x5d   :  { %876 = vmatprep.subr.bf16.mxu1 %v1056_v0 }
  0xfe   :  { %v154_v26 = vpop.f32.mrf.mxu0 }
  0xff   :  { %v1129_v48 = vadd.f32 %v154_v26, %v84_v45 }
 0x100   :  { %v156_v29 = vpop.f32.mrf.mxu0 }
 0x101   :  { %v1119_v31 = vadd.f32 %v156_v29, %v1116_v25  ;;  %v163_v51 = vmax.f32 %v1129_v48, 0.0  ;;  %v937_v48 = vld [vmem:[#allocation6 + $0x1a0] ss:$8 sps:$4 sm:$0xff]  }
 0x102   :  { %v237_v28 = vpop.f32.mrf.mxu1  ;;  %v158_v47 = vpop.f32.mrf.mxu0 }
 0x103   :  { %v238_v32 = vadd.f32 %v237_v28, %v172_v27  ;;  %v1131_v49 = vadd.f32 %v158_v47, %v84_v45  ;;  %v164_v35 = vmax.f32 %v1119_v31, 0.0  ;;  %v935_v31 = vld [vmem:[#allocation6 + $0x1c0] ss:$8 sps:$4 sm:$0xff]   ;;  %v936_v47 = vld [vmem:[#allocation6 + $0x1b0] ss:$8 sps:$4 sm:$0xff]  }
 0x104   :  { %v820_v30 = vpop.f32.mrf.mxu1  ;;  %v160_v60 = vpop.f32.mrf.mxu0 }
 0x105   :  { %v244_v37 = vmax.f32 %v238_v32, 0.0  ;;  %v165_v52 = vmax.f32 %v1131_v49, 0.0 }
 0x106   :  { %v240_v33 = vpop.f32.mrf.mxu1 }
 0x107   :  { %v241_v34 = vadd.f32 %v240_v33, %v172_v27  ;;  %v524_v54 = vpack.c.bf16 %v165_v52, %v163_v51  ;;  %v161_v33 = vadd.f32 %v160_v60, %v1116_v25  ;;  %v653_v25 = vsel %vm651_vm6, %v934_v43, 0 }
 0x108   :  { %v821_v36 = vpop.f32.mrf.mxu1 }
 0x109   :  { %v245_v38 = vmax.f32 %v241_v34, 0.0 }
 0x10b   :  { %v259_v39 = vpack.c.bf16 %v245_v38, %v244_v37  ;;  %v166_v37 = vmax.f32 %v161_v33, 0.0 }
 0x10d   :  { %837 = vmatmul.mubr.msk.bf16.vlgmr.msra.gmra.mxu0 %vm300_vm5, %v259_v39 }
 0x10e   :  { %859 = vmatpush3.bf16.msra.mxu0 %v569_v40  ;;  %872 = vmatprep.mubr.msk.bf16.mxu0 %vm1057_vm0, %v1056_v0 }
 0x10f   :  { %860 = vmatprep.subr.bf16.mxu0 %v1056_v0 }
 0x112   :  { %861 = vmatpush3.bf16.msra.mxu0 %v921_v41 }
 0x113   :  { %862 = vmatprep.subr.bf16.mxu0 %v1056_v0 }
 0x116   :  { %863 = vmatpush3.bf16.msra.mxu0 %v922_v42 }
 0x117   :  { %864 = vmatprep.subr.bf16.mxu0 %v1056_v0 }
 0x11a   :  { %865 = vmatpush3.bf16.msra.mxu0 %v923_v44 }
 0x11b   :  { %866 = vmatprep.subr.bf16.mxu0 %v1056_v0 }
 0x11e   :  { %867 = vmatpush3.bf16.msra.mxu0 %v924_v46 }
 0x11f   :  { %868 = vmatprep.subr.bf16.mxu0 %v1056_v0 }
 0x122   :  { %869 = vmatpush3.bf16.msra.mxu0 %v925_v50 }
 0x123   :  { %870 = vmatprep.subr.bf16.mxu0 %v1056_v0 }
 0x126   :  { %871 = vmatpush3.bf16.msra.mxu0 %v926_v53  ;;  %v623_v53 = vld [vmem:[#allocation7 + $0x5] ss:$0 sm:$0xff] }
 0x129   :  { %873 = vmatmul.mubr.msk.bf16.vlgmr.msra.gmra.mxu0 %vm300_vm5, %v524_v54  ;;  %v401_v54 = vld [vmem:[#allocation7 + $0x3] ss:$0 sm:$0xff] }
 0x1cd   :  { %v342_v62 = vpop.f32.mrf.mxu0 }
 0x1ce   :  { %v343_v63 = vadd.f32 %v342_v62, %v260_v61 }
 0x1cf   :  { %v838_v1 = vpop.f32.mrf.mxu0 }
 0x1d0   :  { %v349_v2 = vsub.f32 0.0, %v343_v63 }
 0x1d1   :  { %v345_v3 = vpop.f32.mrf.mxu0 }
 0x1d2   :  { %v351_v4 = vmul.f32 1.442695, %v349_v2  ;;  %v346_v5 = vadd.f32 %v345_v3, %v260_v61 }
 0x1d3   :  { %v839_v6 = vpop.f32.mrf.mxu0 }
 0x1d4   :  { %938 = vpow2.f32 %v351_v4  ;;  %v350_v7 = vsub.f32 0.0, %v346_v5 }
 0x1d6   :  { %v353_v8 = vmul.f32 1.442695, %v350_v7 }
 0x1d8   :  { %940 = vpow2.f32 %v353_v8 }
 0x1e1   :  { %v939_v9 = vpop.eup %938 }
 0x1e2   :  { %v355_v10 = vadd.f32 1.0, %v939_v9 }
 0x1e4   :  { %942 = vrcp.f32 %v355_v10 }
 0x1e5   :  { %v941_v11 = vpop.eup %940 }
 0x1e6   :  { %v356_v12 = vadd.f32 1.0, %v941_v11 }
 0x1e8   :  { %944 = vrcp.f32 %v356_v12 }
 0x1e9   :  { %v605_v17 = vpop.f32.mrf.mxu0 }
 0x1ea   :  { %v606_v24 = vadd.f32 %v605_v17, %v525_v23 }
 0x1eb   :  { %v874_v20 = vpop.f32.mrf.mxu0 }
 0x1ec   :  { %v612_v28 = vmax.f32 %v606_v24, 0.0 }
 0x1ed   :  { %v608_v22 = vpop.f32.mrf.mxu0 }
 0x1ee   :  { %v609_v26 = vadd.f32 %v608_v22, %v525_v23 }
 0x1ef   :  { %v875_v27 = vpop.f32.mrf.mxu0 }
 0x1f0   :  { %v613_v29 = vmax.f32 %v609_v26, 0.0 }
 0x1f1   :  { %v943_v15 = vpop.eup %942 }
 0x1f2   :  { %361 = vperm.xlu0 %900, %v943_v15   ;;  %v371_v16 = vsub.f32 1.0, %v943_v15  ;;  %v622_v30 = vpack.c.bf16 %v613_v29, %v612_v28 }
 0x1f4   :  { %375 = vperm.xlu1 %901, %v371_v16  }
 0x1f5   :  { %v945_v19 = vpop.eup %944 }
 0x1f6   :  { %366 = vperm.xlu0 %900, %v945_v19   ;;  %v372_v21 = vsub.f32 1.0, %v945_v19 }
 0x1f8   :  { %380 = vperm.xlu1 %901, %v372_v21  }
 0x26d   :  { %v362_v32 = vpop.permute.xlu0 %361 }
 0x26e   :  { %v369_v40 = vmul.f32 %v362_v32, %v163_v51 }
 0x26f   :  { %v376_v34 = vpop.permute.xlu1 %375 }
 0x270   :  { %v383_v38 = vmul.f32 %v376_v34, %v164_v35 }
 0x271   :  { %v367_v36 = vpop.permute.xlu0 %366 }
 0x272   :  { %v370_v41 = vmul.f32 %v367_v36, %v165_v52  ;;  %v385_v44 = vadd.f32 %v383_v38, %v369_v40 }
 0x273   :  { %v381_v39 = vpop.permute.xlu1 %380 }
 0x274   :  { %v384_v42 = vmul.f32 %v381_v39, %v166_v37 }
 0x276   :  { %v386_v45 = vadd.f32 %v384_v42, %v370_v41 }
 0x278   :  { %v400_v46 = vpack.c.bf16 %v386_v45, %v385_v44 }
 0x27a   :  { %855 = vmatmul.mubr.msk.bf16.vlgmr.msra.gmra.mxu1 %vm300_vm5, %v400_v46 }
 0x27b   :  { %877 = vmatpush3.bf16.msra.mxu1 %v653_v25  ;;  %884 = vmatprep.mubr.msk.bf16.mxu1 %vm1057_vm0, %v1056_v0 }
 0x27c   :  { %878 = vmatprep.subr.bf16.mxu1 %v1056_v0 }
 0x27f   :  { %879 = vmatpush3.bf16.msra.mxu1 %v935_v31 }
 0x280   :  { %880 = vmatprep.subr.bf16.mxu1 %v1056_v0 }
 0x283   :  { %881 = vmatpush3.bf16.msra.mxu1 %v936_v47 }
 0x284   :  { %882 = vmatprep.subr.bf16.mxu1 %v1056_v0 }
 0x287   :  { %883 = vmatpush3.bf16.msra.mxu1 %v937_v48 }
 0x28a   :  { %885 = vmatmul.mubr.msk.bf16.vlgmr.msra.gmra.mxu1 %vm647_vm7, %v622_v30 }
 0x33a   :  { %v481_v49 = vpop.f32.mrf.mxu1 }
 0x33b   :  { %v482_v58 = vadd.f32 %v481_v49, %v401_v54 }
 0x33c   :  { %v856_v50 = vpop.f32.mrf.mxu1 }
 0x33d   :  { %v489_v63 = vsel %vm488_vm9, %v482_v58, -inf }
 0x33e   :  { %v484_v51 = vpop.f32.mrf.mxu1 }
 0x33f   :  { %v485_v62 = vadd.f32 %v484_v51, %v401_v54 }
 0x340   :  { %v857_v52 = vpop.f32.mrf.mxu1 }
 0x341   :  { %v492_v2 = vsel %vm488_vm9, %v485_v62, -inf }
 0x34a   :  { %v689_v55 = vpop.f32.mrf.mxu1 }
 0x34b   :  { %v690_v56 = vadd.f32 %v689_v55, %v623_v53 }
 0x34c   :  { %v886_v57 = vpop.f32.mrf.mxu1 }
 0x34d   :  { %v697_v59 = vsel %vm696_vm8, %v690_v56, -inf }
 0x34e   :  { %698 = vmax.xlane.f32.xlu0 %v697_v59  ;;  %v692_v60 = vpop.f32.mrf.mxu1 }
 0x34f   :  { %v693_v0 = vadd.f32 %v692_v60, %v623_v53 }
 0x350   :  { %v887_v61 = vpop.f32.mrf.mxu1 }
 0x351   :  { %v700_v1 = vsel %vm696_vm8, %v693_v0, -inf }
 0x352   :  { %490 = vmax.xlane.f32.xlu0 %v489_v63  ;;  %701 = vmax.xlane.f32.xlu1 %v700_v1 }
 0x356   :  { %493 = vmax.xlane.f32.xlu0 %v492_v2 }
 0x3d7   :  { %v699_v3 = vpop.xlane.xlu0 %698 }
 0x3d8   :  { %v703_v4 = vsub.f32 %v690_v56, %v699_v3 }
 0x3da   :  { %v705_v5 = vmul.f32 1.442695, %v703_v4 }
 0x3db   :  { %v491_v6 = vpop.xlane.xlu0 %490  ;;  %v702_v7 = vpop.xlane.xlu1 %701 }
 0x3dc   :  { %946 = vpow2.f32 %v705_v5  ;;  %v495_v8 = vsub.f32 %v482_v58, %v491_v6  ;;  %v704_v9 = vsub.f32 %v693_v0, %v702_v7 }
 0x3de   :  { %v497_v10 = vmul.f32 1.442695, %v495_v8  ;;  %v707_v11 = vmul.f32 1.442695, %v704_v9 }
 0x3df   :  { %v494_v12 = vpop.xlane.xlu0 %493 }
 0x3e0   :  { %948 = vpow2.f32 %v497_v10  ;;  %v496_v13 = vsub.f32 %v485_v62, %v494_v12 }
 0x3e1   :  { %950 = vpow2.f32 %v707_v11 }
 0x3e2   :  { %v499_v14 = vmul.f32 1.442695, %v496_v13 }
 0x3e4   :  { %952 = vpow2.f32 %v499_v14 }
 0x3e9   :  { %v947_v15 = vpop.eup %946 }
 0x3ea   :  { %v709_v16 = vsel %vm696_vm8, %v947_v15, 0.0 }
 0x3eb   :  { %710 = vadd.xlane.f32.xlu1 %v709_v16 }
 0x3ed   :  { %v949_v17 = vpop.eup %948 }
 0x3ee   :  { %v951_v18 = vpop.eup %950  ;;  %v501_v19 = vsel %vm488_vm9, %v949_v17, 0.0 }
 0x3ef   :  { %502 = vadd.xlane.f32.xlu1 %v501_v19  ;;  %v712_v20 = vsel %vm696_vm8, %v951_v18, 0.0 }
 0x3f0   :  { %713 = vadd.xlane.f32.xlu0 %v712_v20 }
 0x3f1   :  { %v953_v21 = vpop.eup %952 }
 0x3f2   :  { %v504_v22 = vsel %vm488_vm9, %v953_v21, 0.0 }
 0x3f4   :  { %505 = vadd.xlane.f32.xlu0 %v504_v22 }
 0x474   :  { %v711_v23 = vpop.xlane.xlu1 %710 }
 0x475   :  { %954 = vrcp.f32 %v711_v23 }
 0x478   :  { %v503_v24 = vpop.xlane.xlu1 %502 }
 0x479   :  { %v714_v26 = vpop.xlane.xlu0 %713  ;;  %956 = vrcp.f32 %v503_v24 }
 0x47a   :  { %958 = vrcp.f32 %v714_v26 }
 0x47d   :  { %v506_v27 = vpop.xlane.xlu0 %505 }
 0x47e   :  { %960 = vrcp.f32 %v506_v27 }
 0x482   :  { %v955_v28 = vpop.eup %954 }
 0x483   :  { %v717_v29 = vmul.f32 %v955_v28, %v947_v15 }
 0x485   :  { %723 = vrot.lane.b32.xlu1 %v717_v29, %s1059_s2 }
 0x486   :  { %v957_v30 = vpop.eup %956 }
 0x487   :  { %v959_v32 = vpop.eup %958  ;;  %v509_v33 = vmul.f32 %v957_v30, %v949_v17 }
 0x488   :  { %v718_v34 = vmul.f32 %v959_v32, %v951_v18 }
 0x489   :  { %719 = vst.msk [vmem:[%s1188_s4] sm:$0xff] %vm488_vm9, %v509_v33 }
 0x48a   :  { %725 = vrot.lane.b32.xlu0 %v718_v34, %s1059_s2 }
 0x48b   :  { %v961_v35 = vpop.eup %960 }
 0x48c   :  { %v510_v36 = vmul.f32 %v961_v35, %v953_v21 }
 0x48e   :  { %720 = vst.msk [vmem:[%s1188_s4 + $0x8] sm:$0xff] %vm488_vm9, %v510_v36 }
 0x4f7   :  { %v724_v37 = vpop.permute.xlu1 %723 }
 0x4f8   :  { %730 = vst.msk [vmem:[%s1188_s4] sm:$0xff] %vm729_vm10, %v724_v37 }
 0x4fc   :  { %v726_v38 = vpop.permute.xlu0 %725 }
 0x4fd   :  { %731 = vst.msk [vmem:[%s1188_s4 + $0x8] sm:$0xff] %vm729_vm10, %v726_v38 }
 0x4fe   :  { %736 = vsyncpa [#allocation3], 1 }
 0x4ff   :  { %737 = vsyncpa [#allocation5], 1 }
 0x500   :  { %738 = vsyncpa [#allocation8], 1 }

</bundles_post_ra>
